<compile_context>
chip_gen: v7x
topology: tpu7x:2x2x1
jax: 0.10.0
libtpu: 0.0.40
codegen_flags: <defaults>
</compile_context>

<pallas_src>
import jax
import jax.numpy as jnp
from jax.experimental import pallas as pl
from jax.experimental.pallas import tpu as pltpu

INPUT_SIZE = 64
IN_PAD = 128             # lane-dense padded input width (K of the layer-1 matmul)
HIDDEN_SIZE = 256
NUM_CLASSES = 40
OUT_PAD = 128            # lane-dense padded classifier width
BATCH = 8
BN_EPS = 1e-5
MAX_TILE = 512           # batch-tile cap (from measured tiling sweep)


def _round_up(n, m):
    return ((n + m - 1) // m) * m


# ---------------------------------------------------------------------------
# Kernel: x(tb,128)bf16 -> [MXU] -> relu -> [MXU] -> relu -> [MXU] -> out(tb,128)f32
# ---------------------------------------------------------------------------
def mlp_kernel(x_ref, w1_ref, b1_ref, w2_ref, b2_ref, w3_ref, b3_ref, out_ref):
    # Layer 1: Linear + ReLU (input zero-padded 64->128; pad rows of w1 are 0).
    h = jnp.dot(x_ref[...], w1_ref[...], preferred_element_type=jnp.float32)
    h = jnp.maximum(h + b1_ref[...], 0.0)

    # Layer 2: Linear + ReLU (BN1 pre-folded into W2/b2).
    h = jnp.dot(h.astype(w2_ref.dtype), w2_ref[...],
                preferred_element_type=jnp.float32)
    h = jnp.maximum(h + b2_ref[...], 0.0)

    # Classifier: Linear (BN2 pre-folded), lane-dense padded to 128 outputs.
    out = jnp.dot(h.astype(w3_ref.dtype), w3_ref[...],
                  preferred_element_type=jnp.float32)
    out_ref[...] = (out + b3_ref[...]).astype(out_ref.dtype)


# ---------------------------------------------------------------------------
# Parameter prep: fold eval-mode BN into next layer, pad w1/classifier, cast bf16
# ---------------------------------------------------------------------------
def prep_params(params):
    (w1, b1, g1, be1, m1, v1, w2, b2, g2, be2, m2, v2, w3, b3) = params

    s1 = g1 / jnp.sqrt(v1 + BN_EPS)          # (1, H)
    t1 = be1 - m1 * s1
    s2 = g2 / jnp.sqrt(v2 + BN_EPS)
    t2 = be2 - m2 * s2

    # Fold BN1 into layer 2:  (h*s1 + t1) @ W2 + b2 == h @ (s1.T*W2) + (t1@W2 + b2)
    w2f = w2 * s1.T                           # (H, H)
    b2f = t1 @ w2 + b2                        # (1, H)
    # Fold BN2 into classifier.
    w3f = w3 * s2.T                           # (H, C)
    b3f = t2 @ w3 + b3                        # (1, C)

    # Zero-pad layer-1 weight rows 64 -> 128 (matches the lane-dense padded x).
    w1p = jnp.zeros((IN_PAD, HIDDEN_SIZE), jnp.float32).at[:INPUT_SIZE, :].set(w1)
    # Pad classifier to a lane-dense 128-wide output.
    w3p = jnp.zeros((HIDDEN_SIZE, OUT_PAD), jnp.float32).at[:, :NUM_CLASSES].set(w3f)
    b3p = jnp.zeros((1, OUT_PAD), jnp.float32).at[:, :NUM_CLASSES].set(b3f)

    bf = jnp.bfloat16
    return (w1p.astype(bf), b1.astype(jnp.float32),
            w2f.astype(bf), b2f.astype(jnp.float32),
            w3p.astype(bf), b3p.astype(jnp.float32))


# ---------------------------------------------------------------------------
# Batch-tile choice
# ---------------------------------------------------------------------------
def _choose_tile(B):
    """Multiple-of-16 batch tile (bf16 sublane packing), capped at MAX_TILE,
    and picked so the grid has >=2 steps whenever the batch allows it
    (v7x megacore sharding of the 'parallel' axis)."""
    B16 = _round_up(max(B, 1), 16)
    tb = min(MAX_TILE, max(16, _round_up((B16 + 1) // 2, 16)))
    B_pad = _round_up(B16, tb)
    return tb, B_pad


# ---------------------------------------------------------------------------
# Wrapper
# ---------------------------------------------------------------------------
def mlp_forward(x, fused_params):
    (w1, b1, w2, b2, w3, b3) = fused_params
    B = x.shape[0]
    tb, B_pad = _choose_tile(B)

    # Zero-pad batch to a tile multiple and features to the lane-dense 128 width.
    x = jnp.pad(x, ((0, B_pad - B), (0, IN_PAD - x.shape[1]))).astype(jnp.bfloat16)

    def _run(single_buffer_weights):
        if single_buffer_weights:
            # Constant-index blocks: single buffer — no point double-buffering
            # something whose index_map never changes.
            full = lambda shape: pl.BlockSpec(shape, lambda i: (0, 0),
                                              pipeline_mode=pl.Buffered(1))
        else:
            full = lambda shape: pl.BlockSpec(shape, lambda i: (0, 0))

        return pl.pallas_call(
            mlp_kernel,
            out_shape=jax.ShapeDtypeStruct((B_pad, OUT_PAD), jnp.float32),
            grid_spec=pltpu.PrefetchScalarGridSpec(
                num_scalar_prefetch=0,
                grid=(B_pad // tb,),
                in_specs=[
                    pl.BlockSpec((tb, IN_PAD), lambda i: (i, 0)),   # x tile (bf16)
                    full((IN_PAD, HIDDEN_SIZE)),                    # w1 padded (bf16)
                    full((1, HIDDEN_SIZE)),                         # b1 (f32)
                    full((HIDDEN_SIZE, HIDDEN_SIZE)),               # w2 folded (bf16)
                    full((1, HIDDEN_SIZE)),                         # b2 folded (f32)
                    full((HIDDEN_SIZE, OUT_PAD)),                   # w3 folded+padded (bf16)
                    full((1, OUT_PAD)),                             # b3 folded+padded (f32)
                ],
                out_specs=pl.BlockSpec((tb, OUT_PAD), lambda i: (i, 0)),
            ),
            compiler_params=pltpu.CompilerParams(
                dimension_semantics=("parallel",)),
        )(x, w1, b1, w2, b2, w3, b3)

    try:
        out = _run(True)
    except Exception:
        # Fallback: jax/Mosaic versions without pipeline_mode / Buffered(1)
        # support use the default double-buffering (correctness unchanged).
        out = _run(False)

    return out[:B, :NUM_CLASSES]


# ---------------------------------------------------------------------------
# Parameter construction (torch-like: W stored pre-transposed as (in, out))
# ---------------------------------------------------------------------------
def make_params(key):
    ks = jax.random.split(key, 14)

    def lin(kw, kb, fan_in, fan_out):
        lim = 1.0 / jnp.sqrt(fan_in)
        w = jax.random.uniform(kw, (fan_in, fan_out), jnp.float32, -lim, lim)
        b = jax.random.uniform(kb, (1, fan_out), jnp.float32, -lim, lim)
        return w, b

    def bn(kg, kb, km, kv, feat):
        gamma = 1.0 + 0.1 * jax.random.normal(kg, (1, feat), jnp.float32)
        beta = 0.1 * jax.random.normal(kb, (1, feat), jnp.float32)
        r_mean = 0.1 * jax.random.normal(km, (1, feat), jnp.float32)
        r_var = jnp.abs(jax.random.normal(kv, (1, feat), jnp.float32)) + 0.5
        return gamma, beta, r_mean, r_var

    w1, b1 = lin(ks[0], ks[1], INPUT_SIZE, HIDDEN_SIZE)
    g1, be1, m1, v1 = bn(ks[2], ks[3], ks[4], ks[5], HIDDEN_SIZE)
    w2, b2 = lin(ks[6], ks[7], HIDDEN_SIZE, HIDDEN_SIZE)
    g2, be2, m2, v2 = bn(ks[8], ks[9], ks[10], ks[11], HIDDEN_SIZE)
    w3, b3 = lin(ks[12], ks[13], HIDDEN_SIZE, NUM_CLASSES)
    return (w1, b1, g1, be1, m1, v1, w2, b2, g2, be2, m2, v2, w3, b3)


# ---------------------------------------------------------------------------
# References
# ---------------------------------------------------------------------------
def mlp_reference_f32(x, params):
    """Original module semantics (eval-mode BN), pure f32."""
    (w1, b1, g1, be1, m1, v1, w2, b2, g2, be2, m2, v2, w3, b3) = params
    s1 = g1 / jnp.sqrt(v1 + BN_EPS); t1 = be1 - m1 * s1
    s2 = g2 / jnp.sqrt(v2 + BN_EPS); t2 = be2 - m2 * s2
    h = jnp.maximum(x @ w1 + b1, 0.0) * s1 + t1
    h = jnp.maximum(h @ w2 + b2, 0.0) * s2 + t2
    return h @ w3 + b3


def mlp_reference_bf16(x, fused_params):
    """Mirrors the kernel's bf16-weights / f32-accumulate arithmetic."""
    (w1, b1, w2, b2, w3, b3) = fused_params
    xp = jnp.pad(x, ((0, 0), (0, w1.shape[0] - x.shape[1]))).astype(jnp.bfloat16)
    h = jnp.dot(xp, w1, preferred_element_type=jnp.float32)
    h = jnp.maximum(h + b1, 0.0)
    h = jnp.dot(h.astype(jnp.bfloat16), w2, preferred_element_type=jnp.float32)
    h = jnp.maximum(h + b2, 0.0)
    out = jnp.dot(h.astype(jnp.bfloat16), w3, preferred_element_type=jnp.float32) + b3
    return out[:, :NUM_CLASSES]


if __name__ == "__main__":
    key = jax.random.PRNGKey(0)
    kx, kxb, kp = jax.random.split(key, 3)
    params = make_params(kp)
    fused = prep_params(params)

    # Small (deployment-size) batch.
    x = jax.random.normal(kx, (BATCH, INPUT_SIZE), jnp.float32)
    out = jax.block_until_ready(mlp_forward(x, fused))
    assert out.shape == (BATCH, NUM_CLASSES)

    # Tight check against a JAX reference mirroring the kernel's bf16 path.
    ref_bf16 = mlp_reference_bf16(x, fused)
    assert jnp.allclose(out, ref_bf16, atol=1e-3, rtol=1e-3), \
        f"bf16-path mismatch: {jnp.max(jnp.abs(out - ref_bf16))}"

    # Loose check against the original f32 eval-mode module semantics
    # (difference is only bf16 weight/activation rounding).
    ref_f32 = mlp_reference_f32(x, params)
    assert jnp.allclose(out, ref_f32, atol=5e-2, rtol=5e-2), \
        f"f32-reference mismatch: {jnp.max(jnp.abs(out - ref_f32))}"

    # Larger non-multiple-of-16 batch: exercises batch padding and a >=2-step
    # "parallel" grid (megacore sharding path on v7x).
    xb = jax.random.normal(kxb, (200, INPUT_SIZE), jnp.float32)
    outb = jax.block_until_ready(mlp_forward(xb, fused))
    refb = mlp_reference_bf16(xb, fused)
    assert outb.shape == (200, NUM_CLASSES)
    assert jnp.allclose(outb, refb, atol=1e-3, rtol=1e-3), \
        f"large-batch mismatch: {jnp.max(jnp.abs(outb - refb))}"

    print("KERNEL_OK")
</pallas_src>

<mosaic_0001>
module attributes {stable_mosaic.version = 11 : i64} {
  func.func @mlp_kernel(%arg0: i32, %arg1: memref<16x128xbf16, #tpu.memory_space<vmem>>, %arg2: memref<128x256xbf16, #tpu.memory_space<vmem>>, %arg3: memref<1x256xf32, #tpu.memory_space<vmem>>, %arg4: memref<256x256xbf16, #tpu.memory_space<vmem>>, %arg5: memref<1x256xf32, #tpu.memory_space<vmem>>, %arg6: memref<256x128xbf16, #tpu.memory_space<vmem>>, %arg7: memref<1x128xf32, #tpu.memory_space<vmem>>, %arg8: memref<16x128xf32, #tpu.memory_space<vmem>>) attributes {dimension_semantics = [#tpu.dimension_semantics<parallel>], iteration_bounds = array<i64: 1>, scalar_prefetch = 0 : i64, scratch_operands = 0 : i64, tpu.core_type = #tpu.core_type<tc>, window_params = [{transform_indices = @transform_0, window_bounds = array<i64: 16, 128>}, {pipeline_mode = #tpu.pipeline_mode<synchronous>, transform_indices = @transform_1, window_bounds = array<i64: 128, 256>}, {pipeline_mode = #tpu.pipeline_mode<synchronous>, transform_indices = @transform_2, window_bounds = array<i64: 1, 256>}, {pipeline_mode = #tpu.pipeline_mode<synchronous>, transform_indices = @transform_3, window_bounds = array<i64: 256, 256>}, {pipeline_mode = #tpu.pipeline_mode<synchronous>, transform_indices = @transform_4, window_bounds = array<i64: 1, 256>}, {pipeline_mode = #tpu.pipeline_mode<synchronous>, transform_indices = @transform_5, window_bounds = array<i64: 256, 128>}, {pipeline_mode = #tpu.pipeline_mode<synchronous>, transform_indices = @transform_6, window_bounds = array<i64: 1, 128>}, {transform_indices = @transform_7, window_bounds = array<i64: 16, 128>}]} {
    %c0 = arith.constant 0 : index
    %c0_0 = arith.constant 0 : index
    %0 = vector.load %arg1[%c0, %c0_0] : memref<16x128xbf16, #tpu.memory_space<vmem>>, vector<16x128xbf16>
    %c0_1 = arith.constant 0 : index
    %c0_2 = arith.constant 0 : index
    %1 = vector.load %arg2[%c0_1, %c0_2] : memref<128x256xbf16, #tpu.memory_space<vmem>>, vector<128x256xbf16>
    %cst = arith.constant dense<0.000000e+00> : vector<16x256xf32>
    %2 = tpu.matmul %0, %1, %cst {dimension_numbers = #tpu.dot_dimension_numbers<[1], [0], [0], [1], [0, 0, 1, 1], [], []>} : vector<16x128xbf16>, vector<128x256xbf16>, vector<16x256xf32> -> vector<16x256xf32>
    %c0_3 = arith.constant 0 : index
    %c0_4 = arith.constant 0 : index
    %3 = vector.load %arg3[%c0_3, %c0_4] : memref<1x256xf32, #tpu.memory_space<vmem>>, vector<1x256xf32>
    %4 = vector.broadcast %3 : vector<1x256xf32> to vector<16x256xf32>
    %5 = arith.addf %2, %4 : vector<16x256xf32>
    %cst_5 = arith.constant 0.000000e+00 : f32
    %6 = vector.broadcast %cst_5 : f32 to vector<16x256xf32>
    %7 = arith.maximumf %5, %6 : vector<16x256xf32>
    %8 = arith.truncf %7 : vector<16x256xf32> to vector<16x256xbf16>
    %c0_6 = arith.constant 0 : index
    %c0_7 = arith.constant 0 : index
    %9 = vector.load %arg4[%c0_6, %c0_7] : memref<256x256xbf16, #tpu.memory_space<vmem>>, vector<256x256xbf16>
    %cst_8 = arith.constant dense<0.000000e+00> : vector<16x256xf32>
    %10 = tpu.matmul %8, %9, %cst_8 {dimension_numbers = #tpu.dot_dimension_numbers<[1], [0], [0], [1], [0, 0, 1, 1], [], []>} : vector<16x256xbf16>, vector<256x256xbf16>, vector<16x256xf32> -> vector<16x256xf32>
    %c0_9 = arith.constant 0 : index
    %c0_10 = arith.constant 0 : index
    %11 = vector.load %arg5[%c0_9, %c0_10] : memref<1x256xf32, #tpu.memory_space<vmem>>, vector<1x256xf32>
    %12 = vector.broadcast %11 : vector<1x256xf32> to vector<16x256xf32>
    %13 = arith.addf %10, %12 : vector<16x256xf32>
    %cst_11 = arith.constant 0.000000e+00 : f32
    %14 = vector.broadcast %cst_11 : f32 to vector<16x256xf32>
    %15 = arith.maximumf %13, %14 : vector<16x256xf32>
    %16 = arith.truncf %15 : vector<16x256xf32> to vector<16x256xbf16>
    %c0_12 = arith.constant 0 : index
    %c0_13 = arith.constant 0 : index
    %17 = vector.load %arg6[%c0_12, %c0_13] : memref<256x128xbf16, #tpu.memory_space<vmem>>, vector<256x128xbf16>
    %cst_14 = arith.constant dense<0.000000e+00> : vector<16x128xf32>
    %18 = tpu.matmul %16, %17, %cst_14 {dimension_numbers = #tpu.dot_dimension_numbers<[1], [0], [0], [1], [0, 0, 1, 1], [], []>} : vector<16x256xbf16>, vector<256x128xbf16>, vector<16x128xf32> -> vector<16x128xf32>
    %c0_15 = arith.constant 0 : index
    %c0_16 = arith.constant 0 : index
    %19 = vector.load %arg7[%c0_15, %c0_16] : memref<1x128xf32, #tpu.memory_space<vmem>>, vector<1x128xf32>
    %20 = vector.broadcast %19 : vector<1x128xf32> to vector<16x128xf32>
    %21 = arith.addf %18, %20 : vector<16x128xf32>
    %c0_17 = arith.constant 0 : index
    %c0_18 = arith.constant 0 : index
    %22 = vector.load %arg8[%c0_17, %c0_18] : memref<16x128xf32, #tpu.memory_space<vmem>>, vector<16x128xf32>
    tpu.vector_store %arg8[%c0_17, %c0_18], %21 {strides = array<i32>} : memref<16x128xf32, #tpu.memory_space<vmem>>, vector<16x128xf32>,
    return
  }
  func.func @transform_0(%arg0: i32) -> (i32, i32) {
    %c0_i32 = arith.constant 0 : i32
    %c0_i32_0 = arith.constant 0 : i32
    return %arg0, %c0_i32 : i32, i32
  }
  func.func @transform_1(%arg0: i32) -> (i32, i32) {
    %c0_i32 = arith.constant 0 : i32
    %c0_i32_0 = arith.constant 0 : i32
    %c0_i32_1 = arith.constant 0 : i32
    return %c0_i32, %c0_i32_0 : i32, i32
  }
  func.func @transform_2(%arg0: i32) -> (i32, i32) {
    %c0_i32 = arith.constant 0 : i32
    %c0_i32_0 = arith.constant 0 : i32
    %c0_i32_1 = arith.constant 0 : i32
    return %c0_i32, %c0_i32_0 : i32, i32
  }
  func.func @transform_3(%arg0: i32) -> (i32, i32) {
    %c0_i32 = arith.constant 0 : i32
    %c0_i32_0 = arith.constant 0 : i32
    %c0_i32_1 = arith.constant 0 : i32
    return %c0_i32, %c0_i32_0 : i32, i32
  }
  func.func @transform_4(%arg0: i32) -> (i32, i32) {
    %c0_i32 = arith.constant 0 : i32
    %c0_i32_0 = arith.constant 0 : i32
    %c0_i32_1 = arith.constant 0 : i32
    return %c0_i32, %c0_i32_0 : i32, i32
  }
  func.func @transform_5(%arg0: i32) -> (i32, i32) {
    %c0_i32 = arith.constant 0 : i32
    %c0_i32_0 = arith.constant 0 : i32
    %c0_i32_1 = arith.constant 0 : i32
    return %c0_i32, %c0_i32_0 : i32, i32
  }
  func.func @transform_6(%arg0: i32) -> (i32, i32) {
    %c0_i32 = arith.constant 0 : i32
    %c0_i32_0 = arith.constant 0 : i32
    %c0_i32_1 = arith.constant 0 : i32
    return %c0_i32, %c0_i32_0 : i32, i32
  }
  func.func @transform_7(%arg0: i32) -> (i32, i32) {
    %c0_i32 = arith.constant 0 : i32
    %c0_i32_0 = arith.constant 0 : i32
    return %arg0, %c0_i32 : i32, i32
  }
}

module attributes {stable_mosaic.version = 11 : i64} {
  func.func @mlp_kernel(%arg0: i32, %arg1: memref<16x128xbf16, #tpu.memory_space<vmem>>, %arg2: memref<128x256xbf16, #tpu.memory_space<vmem>>, %arg3: memref<1x256xf32, #tpu.memory_space<vmem>>, %arg4: memref<256x256xbf16, #tpu.memory_space<vmem>>, %arg5: memref<1x256xf32, #tpu.memory_space<vmem>>, %arg6: memref<256x128xbf16, #tpu.memory_space<vmem>>, %arg7: memref<1x128xf32, #tpu.memory_space<vmem>>, %arg8: memref<16x128xf32, #tpu.memory_space<vmem>>) attributes {dimension_semantics = [#tpu.dimension_semantics<parallel>], iteration_bounds = array<i64: 1>, scalar_prefetch = 0 : i64, scratch_operands = 0 : i64, tpu.core_type = #tpu.core_type<tc>, window_params = [{transform_indices = @transform_0, window_bounds = array<i64: 16, 128>}, {pipeline_mode = #tpu.pipeline_mode<synchronous>, transform_indices = @transform_1, window_bounds = array<i64: 128, 256>}, {pipeline_mode = #tpu.pipeline_mode<synchronous>, transform_indices = @transform_2, window_bounds = array<i64: 1, 256>}, {pipeline_mode = #tpu.pipeline_mode<synchronous>, transform_indices = @transform_3, window_bounds = array<i64: 256, 256>}, {pipeline_mode = #tpu.pipeline_mode<synchronous>, transform_indices = @transform_4, window_bounds = array<i64: 1, 256>}, {pipeline_mode = #tpu.pipeline_mode<synchronous>, transform_indices = @transform_5, window_bounds = array<i64: 256, 128>}, {pipeline_mode = #tpu.pipeline_mode<synchronous>, transform_indices = @transform_6, window_bounds = array<i64: 1, 128>}, {transform_indices = @transform_7, window_bounds = array<i64: 16, 128>}]} {
    %c0 = arith.constant 0 : index
    %c0_0 = arith.constant 0 : index
    %0 = vector.load %arg1[%c0, %c0_0] : memref<16x128xbf16, #tpu.memory_space<vmem>>, vector<16x128xbf16>
    %c0_1 = arith.constant 0 : index
    %c0_2 = arith.constant 0 : index
    %1 = vector.load %arg2[%c0_1, %c0_2] : memref<128x256xbf16, #tpu.memory_space<vmem>>, vector<128x256xbf16>
    %cst = arith.constant dense<0.000000e+00> : vector<16x256xf32>
    %2 = tpu.matmul %0, %1, %cst {dimension_numbers = #tpu.dot_dimension_numbers<[1], [0], [0], [1], [0, 0, 1, 1], [], []>} : vector<16x128xbf16>, vector<128x256xbf16>, vector<16x256xf32> -> vector<16x256xf32>
    %c0_3 = arith.constant 0 : index
    %c0_4 = arith.constant 0 : index
    %3 = vector.load %arg3[%c0_3, %c0_4] : memref<1x256xf32, #tpu.memory_space<vmem>>, vector<1x256xf32>
    %4 = vector.broadcast %3 : vector<1x256xf32> to vector<16x256xf32>
    %5 = arith.addf %2, %4 : vector<16x256xf32>
    %cst_5 = arith.constant 0.000000e+00 : f32
    %6 = vector.broadcast %cst_5 : f32 to vector<16x256xf32>
    %7 = arith.maximumf %5, %6 : vector<16x256xf32>
    %8 = arith.truncf %7 : vector<16x256xf32> to vector<16x256xbf16>
    %c0_6 = arith.constant 0 : index
    %c0_7 = arith.constant 0 : index
    %9 = vector.load %arg4[%c0_6, %c0_7] : memref<256x256xbf16, #tpu.memory_space<vmem>>, vector<256x256xbf16>
    %cst_8 = arith.constant dense<0.000000e+00> : vector<16x256xf32>
    %10 = tpu.matmul %8, %9, %cst_8 {dimension_numbers = #tpu.dot_dimension_numbers<[1], [0], [0], [1], [0, 0, 1, 1], [], []>} : vector<16x256xbf16>, vector<256x256xbf16>, vector<16x256xf32> -> vector<16x256xf32>
    %c0_9 = arith.constant 0 : index
    %c0_10 = arith.constant 0 : index
    %11 = vector.load %arg5[%c0_9, %c0_10] : memref<1x256xf32, #tpu.memory_space<vmem>>, vector<1x256xf32>
    %12 = vector.broadcast %11 : vector<1x256xf32> to vector<16x256xf32>
    %13 = arith.addf %10, %12 : vector<16x256xf32>
    %cst_11 = arith.constant 0.000000e+00 : f32
    %14 = vector.broadcast %cst_11 : f32 to vector<16x256xf32>
    %15 = arith.maximumf %13, %14 : vector<16x256xf32>
    %16 = arith.truncf %15 : vector<16x256xf32> to vector<16x256xbf16>
    %c0_12 = arith.constant 0 : index
    %c0_13 = arith.constant 0 : index
    %17 = vector.load %arg6[%c0_12, %c0_13] : memref<256x128xbf16, #tpu.memory_space<vmem>>, vector<256x128xbf16>
    %cst_14 = arith.constant dense<0.000000e+00> : vector<16x128xf32>
    %18 = tpu.matmul %16, %17, %cst_14 {dimension_numbers = #tpu.dot_dimension_numbers<[1], [0], [0], [1], [0, 0, 1, 1], [], []>} : vector<16x256xbf16>, vector<256x128xbf16>, vector<16x128xf32> -> vector<16x128xf32>
    %c0_15 = arith.constant 0 : index
    %c0_16 = arith.constant 0 : index
    %19 = vector.load %arg7[%c0_15, %c0_16] : memref<1x128xf32, #tpu.memory_space<vmem>>, vector<1x128xf32>
    %20 = vector.broadcast %19 : vector<1x128xf32> to vector<16x128xf32>
    %21 = arith.addf %18, %20 : vector<16x128xf32>
    %c0_17 = arith.constant 0 : index
    %c0_18 = arith.constant 0 : index
    %22 = vector.load %arg8[%c0_17, %c0_18] : memref<16x128xf32, #tpu.memory_space<vmem>>, vector<16x128xf32>
    tpu.vector_store %arg8[%c0_17, %c0_18], %21 {strides = array<i32>} : memref<16x128xf32, #tpu.memory_space<vmem>>, vector<16x128xf32>,
    return
  }
  func.func @transform_0(%arg0: i32) -> (i32, i32) {
    %c0_i32 = arith.constant 0 : i32
    %c0_i32_0 = arith.constant 0 : i32
    return %arg0, %c0_i32 : i32, i32
  }
  func.func @transform_1(%arg0: i32) -> (i32, i32) {
    %c0_i32 = arith.constant 0 : i32
    %c0_i32_0 = arith.constant 0 : i32
    %c0_i32_1 = arith.constant 0 : i32
    return %c0_i32, %c0_i32_0 : i32, i32
  }
  func.func @transform_2(%arg0: i32) -> (i32, i32) {
    %c0_i32 = arith.constant 0 : i32
    %c0_i32_0 = arith.constant 0 : i32
    %c0_i32_1 = arith.constant 0 : i32
    return %c0_i32, %c0_i32_0 : i32, i32
  }
  func.func @transform_3(%arg0: i32) -> (i32, i32) {
    %c0_i32 = arith.constant 0 : i32
    %c0_i32_0 = arith.constant 0 : i32
    %c0_i32_1 = arith.constant 0 : i32
    return %c0_i32, %c0_i32_0 : i32, i32
  }
  func.func @transform_4(%arg0: i32) -> (i32, i32) {
    %c0_i32 = arith.constant 0 : i32
    %c0_i32_0 = arith.constant 0 : i32
    %c0_i32_1 = arith.constant 0 : i32
    return %c0_i32, %c0_i32_0 : i32, i32
  }
  func.func @transform_5(%arg0: i32) -> (i32, i32) {
    %c0_i32 = arith.constant 0 : i32
    %c0_i32_0 = arith.constant 0 : i32
    %c0_i32_1 = arith.constant 0 : i32
    return %c0_i32, %c0_i32_0 : i32, i32
  }
  func.func @transform_6(%arg0: i32) -> (i32, i32) {
    %c0_i32 = arith.constant 0 : i32
    %c0_i32_0 = arith.constant 0 : i32
    %c0_i32_1 = arith.constant 0 : i32
    return %c0_i32, %c0_i32_0 : i32, i32
  }
  func.func @transform_7(%arg0: i32) -> (i32, i32) {
    %c0_i32 = arith.constant 0 : i32
    %c0_i32_0 = arith.constant 0 : i32
    return %arg0, %c0_i32 : i32, i32
  }
}

</mosaic_0001>

<bundles_post_ra>
// kernel: tpu_custom_call.1
= control target key start
LH: loop header
LB: loop body
LE: loop exit
PB: predicated region body
PF: predicated region fallthrough
CT: control target
= control target key end

     0   :  { %12 = vsyncpa [#allocation3], 0  ;;  %s1144_s0 = inlined_call_operand.hbm [shape: bf16[16,128], index: 0, kind: input, shape index: {}]   ;;  %s1145_s1 = inlined_call_operand.hbm [shape: bf16[128,256], index: 1, kind: input, shape index: {}]   ;;  %s1146_s2 = inlined_call_operand.vmem [shape: f32[1,256], index: 2, kind: input, shape index: {}]   ;;  %s1147_s3 = inlined_call_operand.hbm [shape: bf16[256,256], index: 3, kind: input, shape index: {}]   ;;  %s1148_s4 = inlined_call_operand.vmem [shape: f32[1,256], index: 4, kind: input, shape index: {}]   ;;  %s1149_s5 = inlined_call_operand.hbm [shape: bf16[256,128], index: 5, kind: input, shape index: {}]   ;;  %s1150_s6 = inlined_call_operand.vmem [shape: f32[1,128], index: 6, kind: input, shape index: {}]   ;;  %s1151_s7 = inlined_call_operand.hbm [shape: f32[16,128], index: 7, kind: output, shape index: {}]  }
   0x1   :  { %13 = vsyncpa [#allocation6], 0 }
   0x2   :  { %14 = vsyncpa [#allocation9], 0 }
   0x3   :  { %15 = vsyncpa [#allocation4], 0  ;;  %s1003_s24 = smov [#allocation5]   ;;  %s885_s28 = scalar_lea.hbm %s1145_s1, 2048 }
   0x4   :  { %s33_s25 = sshll.u32 %s1003_s24, 4  ;;  %p886_p0 = scmp.ne.s32.totalorder %s1145_s1, %s885_s28  ;;  %s34_s25 = int_to_ptr.vmem [resolvable:$true] %s33_s25 }
   0x5   :  { %p889_p1 = scmp.lt.u32.totalorder %s885_s28, %s1145_s1 }
   0x7   :  { %p891_p2 = pnand %p889_p1, %p886_p0 }
   0x9   :  { %894 = shalt.err (!%p891_p2)
}
   0xa   :  { %s895_s10 = scalar_lea.vmem %s34_s25, 2048  ;;  %p900_p4 = scmp.lt.s32.totalorder %s34_s25, %s34_s25 }
   0xb   :  { %p896_p3 = scmp.ne.s32.totalorder %s34_s25, %s895_s10  ;;  %p901_p5 = scmp.lt.s32.totalorder %s895_s10, %s895_s10 }
   0xd   :  { %p902_p6 = por %p901_p5, %p900_p4 }
   0xf   :  { %p903_p7 = pnand %p902_p6, %p896_p3 }
  0x11   :  { %906 = shalt.err (!%p903_p7)
}
  0x12   :  { %s1004_s11 = smov 128   ;;  %s1005_s12 = smov 8  }
  0x13   :  { %39 = dma.hbm_to_vmem [thread:$0]  %s1145_s1, 2048, %s34_s25, [#allocation6], %s1004_s11, %s1004_s11, %s1005_s12  }
  0x14   :  { %s1006_s15 = smov [#allocation2]   ;;  %s907_s19 = scalar_lea.hbm %s1144_s0, 128 }
  0x15   :  { %s21_s16 = sshll.u32 %s1006_s15, 4  ;;  %p908_p8 = scmp.ne.s32.totalorder %s1144_s0, %s907_s19  ;;  %s22_s16 = int_to_ptr.vmem [resolvable:$true] %s21_s16 }
  0x16   :  { %p911_p9 = scmp.lt.u32.totalorder %s907_s19, %s1144_s0 }
  0x18   :  { %p913_p10 = pnand %p911_p9, %p908_p8 }
  0x1a   :  { %916 = shalt.err (!%p913_p10)
}
  0x1b   :  { %s917_s24 = scalar_lea.vmem %s22_s16, 128  ;;  %p922_p12 = scmp.lt.s32.totalorder %s22_s16, %s22_s16 }
  0x1c   :  { %p918_p11 = scmp.ne.s32.totalorder %s22_s16, %s917_s24  ;;  %p923_p13 = scmp.lt.s32.totalorder %s917_s24, %s917_s24 }
  0x1e   :  { %p924_p0 = por %p923_p13, %p922_p12 }
  0x20   :  { %p925_p1 = pnand %p924_p0, %p918_p11 }
  0x22   :  { %928 = shalt.err (!%p925_p1)
}
  0x23   :  { %s1007_s1 = smov 64   ;;  %s1008_s25 = smov 4  }
  0x24   :  { %27 = dma.hbm_to_vmem [thread:$0]  %s1144_s0, 128, %s22_s16, [#allocation3], %s1007_s1, %s1007_s1, %s1008_s25  }
  0x25   :  { %s1009_s28 = smov [#allocation7]   ;;  %s1010_s30 = smov [#allocation8]  }
  0x26   :  { %s47_s29 = sshll.u32 %s1009_s28, 4  ;;  %s61_s8 = sshll.u32 %s1010_s30, 4  ;;  %s48_s29 = int_to_ptr.vmem [resolvable:$true] %s47_s29  ;;  %s1083_s8 = int_to_ptr.vmem [resolvable:$true] %s61_s8 }
  0x27   :  { %s929_s13 = scalar_lea.hbm %s1147_s3, 4096 }
  0x28   :  { %p930_p2 = scmp.ne.s32.totalorder %s1147_s3, %s929_s13  ;;  %p933_p3 = scmp.lt.u32.totalorder %s929_s13, %s1147_s3 }
  0x2a   :  { %p935_p4 = pnand %p933_p3, %p930_p2 }
  0x2c   :  { %938 = shalt.err (!%p935_p4)
}
  0x2d   :  { %s939_s0 = scalar_lea.vmem %s48_s29, 4096  ;;  %p944_p6 = scmp.lt.s32.totalorder %s48_s29, %s48_s29 }
  0x2e   :  { %p940_p5 = scmp.ne.s32.totalorder %s48_s29, %s939_s0  ;;  %p945_p7 = scmp.lt.s32.totalorder %s939_s0, %s939_s0 }
  0x30   :  { %p946_p8 = por %p945_p7, %p944_p6 }
  0x32   :  { %p947_p9 = pnand %p946_p8, %p940_p5 }
  0x34   :  { %950 = shalt.err (!%p947_p9)
}
  0x35   :  { %53 = dma.hbm_to_vmem [thread:$0]  %s1147_s3, 4096, %s48_s29, [#allocation6], %s1004_s11, %s1004_s11, %s1005_s12  }
  0x36   :  { %s951_s22 = scalar_lea.hbm %s1149_s5, 2048 }
  0x37   :  { %p952_p10 = scmp.ne.s32.totalorder %s1149_s5, %s951_s22  ;;  %p955_p11 = scmp.lt.u32.totalorder %s951_s22, %s1149_s5 }
  0x39   :  { %p957_p12 = pnand %p955_p11, %p952_p10 }
  0x3b   :  { %960 = shalt.err (!%p957_p12)
}
  0x3c   :  { %s961_s28 = scalar_lea.vmem %s1083_s8, 2048  ;;  %p966_p0 = scmp.lt.s32.totalorder %s1083_s8, %s1083_s8 }
  0x3d   :  { %p962_p13 = scmp.ne.s32.totalorder %s1083_s8, %s961_s28  ;;  %p967_p1 = scmp.lt.s32.totalorder %s961_s28, %s961_s28 }
  0x3f   :  { %p968_p2 = por %p967_p1, %p966_p0 }
  0x41   :  { %p969_p3 = pnand %p968_p2, %p962_p13 }
  0x43   :  { %972 = shalt.err (!%p969_p3)
}
  0x44   :  { %67 = dma.hbm_to_vmem [thread:$0]  %s1149_s5, 2048, %s1083_s8, [#allocation9], %s1007_s1, %s1007_s1, %s1008_s25  }
  0x45   :  { %995 = dma.done.wait [#allocation3], 128  }
  0x46   :  { %996 = vsyncadd [#allocation3], 4294967168 }
  0x47   :  { %997 = dma.done.wait [#allocation6], 6144  }
  0x48   :  { %998 = vsyncadd [#allocation6], 4294961152 }
  0x49   :  { %999 = dma.done.wait [#allocation9], 2048  }
  0x4a   :  { %1000 = vsyncadd [#allocation9], 4294965248  ;;  %v1011_v0 = vmov 0   ;;  %v796_v1 = vld [vmem:[#allocation5 + $0x4] ss:$8 sps:$4 sm:$0xff]   ;;  %v820_v27 = vld [vmem:[#allocation2] sm:$0xff]   ;;  %v103_v61 = vlaneseq }
  0x4b   :  { %231 = vmatprep.mubr.bf16.mxu0 %v1011_v0  ;;  %v798_v2 = vld [vmem:[#allocation5] ss:$8 sps:$4 sm:$0xff]   ;;  %199 = vmatprep.subr.bf16.mxu0 %v796_v1  ;;  %v799_v3 = vld [vmem:[#allocation5 + $0x14] ss:$8 sps:$4 sm:$0xff]   ;;  %v801_v4 = vld [vmem:[#allocation5 + $0x10] ss:$8 sps:$4 sm:$0xff]  }
  0x4c   :  { %200 = vmatpush1.bf16.msra.mxu0 %v798_v2  ;;  %v802_v5 = vld [vmem:[#allocation5 + $0x24] ss:$8 sps:$4 sm:$0xff]   ;;  %v804_v6 = vld [vmem:[#allocation5 + $0x20] ss:$8 sps:$4 sm:$0xff]   ;;  %v805_v7 = vld [vmem:[#allocation5 + $0x34] ss:$8 sps:$4 sm:$0xff]  }
  0x4d   :  { %201 = vmatprep.subr.bf16.mxu0 %v799_v3  ;;  %v807_v8 = vld [vmem:[#allocation5 + $0x30] ss:$8 sps:$4 sm:$0xff]   ;;  %v808_v9 = vld [vmem:[#allocation5 + $0x44] ss:$8 sps:$4 sm:$0xff]   ;;  %v823_v11 = vld [vmem:[#allocation7] ss:$8 sps:$4 sm:$0xff]  }
  0x4e   :  { %v821_v10 = vld [vmem:[#allocation7 + $0x4] ss:$8 sps:$4 sm:$0xff]   ;;  %v824_v12 = vld [vmem:[#allocation7 + $0x14] ss:$8 sps:$4 sm:$0xff]   ;;  %v810_v13 = vld [vmem:[#allocation5 + $0x40] ss:$8 sps:$4 sm:$0xff]  }
  0x4f   :  { %452 = vmatprep.subr.bf16.mxu1 %v821_v10  ;;  %v826_v14 = vld [vmem:[#allocation7 + $0x10] ss:$8 sps:$4 sm:$0xff]   ;;  %v811_v15 = vld [vmem:[#allocation5 + $0x54] ss:$8 sps:$4 sm:$0xff]   ;;  %v827_v16 = vld [vmem:[#allocation7 + $0x24] ss:$8 sps:$4 sm:$0xff]  }
  0x50   :  { %202 = vmatpush1.bf16.msra.mxu0 %v801_v4  ;;  %453 = vmatpush1.bf16.msra.mxu1 %v823_v11  ;;  %v813_v17 = vld [vmem:[#allocation5 + $0x50] ss:$8 sps:$4 sm:$0xff]   ;;  %v829_v18 = vld [vmem:[#allocation7 + $0x20] ss:$8 sps:$4 sm:$0xff]   ;;  %v814_v19 = vld [vmem:[#allocation5 + $0x64] ss:$8 sps:$4 sm:$0xff]  }
  0x51   :  { %203 = vmatprep.subr.bf16.mxu0 %v802_v5  ;;  %454 = vmatprep.subr.bf16.mxu1 %v824_v12  ;;  %v830_v20 = vld [vmem:[#allocation7 + $0x34] ss:$8 sps:$4 sm:$0xff]   ;;  %v816_v21 = vld [vmem:[#allocation5 + $0x60] ss:$8 sps:$4 sm:$0xff]   ;;  %v832_v22 = vld [vmem:[#allocation7 + $0x30] ss:$8 sps:$4 sm:$0xff]  }
  0x52   :  { %v817_v23 = vld [vmem:[#allocation5 + $0x74] ss:$8 sps:$4 sm:$0xff]   ;;  %v833_v24 = vld [vmem:[#allocation7 + $0x44] ss:$8 sps:$4 sm:$0xff]   ;;  %v819_v25 = vld [vmem:[#allocation5 + $0x70] ss:$8 sps:$4 sm:$0xff]  }
  0x53   :  { %v835_v26 = vld [vmem:[#allocation7 + $0x40] ss:$8 sps:$4 sm:$0xff]   ;;  %v836_v28 = vld [vmem:[#allocation7 + $0x54] ss:$8 sps:$4 sm:$0xff]   ;;  %v838_v29 = vld [vmem:[#allocation7 + $0x50] ss:$8 sps:$4 sm:$0xff]  }
  0x54   :  { %204 = vmatpush1.bf16.msra.mxu0 %v804_v6  ;;  %455 = vmatpush1.bf16.msra.mxu1 %v826_v14  ;;  %v839_v30 = vld [vmem:[#allocation7 + $0x64] ss:$8 sps:$4 sm:$0xff]   ;;  %v841_v31 = vld [vmem:[#allocation7 + $0x60] ss:$8 sps:$4 sm:$0xff]   ;;  %v842_v32 = vld [vmem:[#allocation7 + $0x74] ss:$8 sps:$4 sm:$0xff]  }
  0x55   :  { %205 = vmatprep.subr.bf16.mxu0 %v805_v7  ;;  %456 = vmatprep.subr.bf16.mxu1 %v827_v16  ;;  %v844_v33 = vld [vmem:[#allocation7 + $0x70] ss:$8 sps:$4 sm:$0xff]   ;;  %v845_v34 = vld [vmem:[#allocation7 + $0x84] ss:$8 sps:$4 sm:$0xff]   ;;  %v847_v35 = vld [vmem:[#allocation7 + $0x80] ss:$8 sps:$4 sm:$0xff]  }
  0x56   :  { %v848_v36 = vld [vmem:[#allocation7 + $0x94] ss:$8 sps:$4 sm:$0xff]   ;;  %v850_v37 = vld [vmem:[#allocation7 + $0x90] ss:$8 sps:$4 sm:$0xff]   ;;  %v851_v38 = vld [vmem:[#allocation7 + $0xa4] ss:$8 sps:$4 sm:$0xff]  }
  0x57   :  { %v853_v39 = vld [vmem:[#allocation7 + $0xa0] ss:$8 sps:$4 sm:$0xff]   ;;  %v854_v40 = vld [vmem:[#allocation7 + $0xb4] ss:$8 sps:$4 sm:$0xff]   ;;  %v856_v41 = vld [vmem:[#allocation7 + $0xb0] ss:$8 sps:$4 sm:$0xff]  }
  0x58   :  { %206 = vmatpush1.bf16.msra.mxu0 %v807_v8  ;;  %457 = vmatpush1.bf16.msra.mxu1 %v829_v18  ;;  %v857_v42 = vld [vmem:[#allocation7 + $0xc4] ss:$8 sps:$4 sm:$0xff]   ;;  %v859_v43 = vld [vmem:[#allocation7 + $0xc0] ss:$8 sps:$4 sm:$0xff]   ;;  %v860_v44 = vld [vmem:[#allocation7 + $0xd4] ss:$8 sps:$4 sm:$0xff]  }
  0x59   :  { %207 = vmatprep.subr.bf16.mxu0 %v808_v9  ;;  %458 = vmatprep.subr.bf16.mxu1 %v830_v20  ;;  %v862_v45 = vld [vmem:[#allocation7 + $0xd0] ss:$8 sps:$4 sm:$0xff]   ;;  %v863_v46 = vld [vmem:[#allocation7 + $0xe4] ss:$8 sps:$4 sm:$0xff]   ;;  %v865_v47 = vld [vmem:[#allocation7 + $0xe0] ss:$8 sps:$4 sm:$0xff]  }
  0x5a   :  { %v866_v48 = vld [vmem:[#allocation7 + $0xf4] ss:$8 sps:$4 sm:$0xff]   ;;  %v868_v49 = vld [vmem:[#allocation7 + $0xf0] ss:$8 sps:$4 sm:$0xff]   ;;  %v869_v50 = vld [vmem:[#allocation8 + $0x40] sm:$0xff]   ;;  %v104_v62 = vshrl.u32 %v103_v61, 7 }
  0x5b   :  { %v870_v51 = vld [vmem:[#allocation8] sm:$0xff]   ;;  %v871_v52 = vld [vmem:[#allocation8 + $0x48] sm:$0xff]   ;;  %v873_v54 = vld [vmem:[#allocation8 + $0x50] sm:$0xff]   ;;  %s1012_s8 = smov [#allocation10]  }
  0x5c   :  { %208 = vmatpush1.bf16.msra.mxu0 %v810_v13  ;;  %459 = vmatpush1.bf16.msra.mxu1 %v832_v22  ;;  %v872_v53 = vld [vmem:[#allocation8 + $0x8] sm:$0xff]   ;;  %v874_v55 = vld [vmem:[#allocation8 + $0x10] sm:$0xff]   ;;  %v875_v56 = vld [vmem:[#allocation8 + $0x58] sm:$0xff]   ;;  %v105_v63 = vsub.s32 0, %v104_v62  ;;  %v109_v1 = vsub.s32 1, %v104_v62  ;;  %s684_s9 = sshll.u32 %s1012_s8, 4  ;;  %s685_s9 = int_to_ptr.vmem [resolvable:$true] %s684_s9 }
  0x5d   :  { %209 = vmatprep.subr.bf16.mxu0 %v811_v15  ;;  %460 = vmatprep.subr.bf16.mxu1 %v833_v24  ;;  %v876_v57 = vld [vmem:[#allocation8 + $0x18] sm:$0xff]   ;;  %v877_v58 = vld [vmem:[#allocation8 + $0x60] sm:$0xff]   ;;  %v879_v60 = vld [vmem:[#allocation8 + $0x68] sm:$0xff]   ;;  %s973_s10 = scalar_lea.vmem %s685_s9, 256  ;;  %p978_p5 = scmp.lt.s32.totalorder %s685_s9, %s685_s9 }
  0x5e   :  { %v878_v59 = vld [vmem:[#allocation8 + $0x20] sm:$0xff]   ;;  %v101_v0 = vld [vmem:[%s1146_s2] sm:$0x3]  ;;  %v880_v18 = vld [vmem:[#allocation8 + $0x28] sm:$0xff]   ;;  %p974_p4 = scmp.ne.s32.totalorder %s685_s9, %s973_s10  ;;  %p979_p6 = scmp.lt.s32.totalorder %s973_s10, %s973_s10 }
  0x5f   :  { %v106_v2 = vrot.slane %v101_v0, %v105_v63  ;;  %v110_v3 = vrot.slane %v101_v0, %v109_v1  ;;  %v882_v20 = vld [vmem:[#allocation8 + $0x30] sm:$0xff]   ;;  %v884_v22 = vld [vmem:[#allocation8 + $0x38] sm:$0xff]  }
  0x60   :  { %210 = vmatpush1.bf16.msra.mxu0 %v813_v17  ;;  %461 = vmatpush1.bf16.msra.mxu1 %v835_v26  ;;  %p980_p7 = por %p979_p6, %p978_p5 }
  0x61   :  { %211 = vmatprep.subr.bf16.mxu0 %v814_v19  ;;  %462 = vmatprep.subr.bf16.mxu1 %v836_v28  ;;  %v881_v19 = vld [vmem:[#allocation8 + $0x70] sm:$0xff]  }
  0x62   :  { %p981_p8 = pnand %p980_p7, %p974_p4 }
  0x64   :  { %212 = vmatpush1.bf16.msra.mxu0 %v816_v21  ;;  %463 = vmatpush1.bf16.msra.mxu1 %v838_v29  ;;  %v883_v21 = vld [vmem:[#allocation8 + $0x78] sm:$0xff]  }
  0x65   :  { %213 = vmatprep.subr.bf16.mxu0 %v817_v23  ;;  %464 = vmatprep.subr.bf16.mxu1 %v839_v30  ;;  %v280_v23 = vld [vmem:[%s1148_s4] sm:$0x3] }
  0x66   :  { %v285_v24 = vrot.slane %v280_v23, %v105_v63 }
  0x68   :  { %214 = vmatpush1.bf16.msra.mxu0 %v819_v25  ;;  %465 = vmatpush1.bf16.msra.mxu1 %v841_v31  ;;  %v289_v25 = vrot.slane %v280_v23, %v109_v1 }
  0x69   :  { %466 = vmatprep.subr.bf16.mxu1 %v842_v32  ;;  %764 = vmatprep.subr.bf16.mxu0 %v869_v50 }
  0x6b   :  { %232 = vmatmul.mubr.bf16.vlgmr.msra.gmra.mrb[0].mxu0 %v820_v27 }
  0x6c   :  { %467 = vmatpush1.bf16.msra.mxu1 %v844_v33  ;;  %765 = vmatpush3.bf16.msra.mxu0 %v870_v51 }
  0x6d   :  { %468 = vmatprep.subr.bf16.mxu1 %v845_v34  ;;  %766 = vmatprep.subr.bf16.mxu0 %v871_v52 }
  0x70   :  { %469 = vmatpush1.bf16.msra.mxu1 %v847_v35  ;;  %767 = vmatpush3.bf16.msra.mxu0 %v872_v53 }
  0x71   :  { %470 = vmatprep.subr.bf16.mxu1 %v848_v36  ;;  %768 = vmatprep.subr.bf16.mxu0 %v873_v54 }
  0x74   :  { %471 = vmatpush1.bf16.msra.mxu1 %v850_v37  ;;  %769 = vmatpush3.bf16.msra.mxu0 %v874_v55 }
  0x75   :  { %472 = vmatprep.subr.bf16.mxu1 %v851_v38  ;;  %770 = vmatprep.subr.bf16.mxu0 %v875_v56 }
  0x78   :  { %473 = vmatpush1.bf16.msra.mxu1 %v853_v39  ;;  %771 = vmatpush3.bf16.msra.mxu0 %v876_v57 }
  0x79   :  { %474 = vmatprep.subr.bf16.mxu1 %v854_v40  ;;  %772 = vmatprep.subr.bf16.mxu0 %v877_v58 }
  0x7c   :  { %475 = vmatpush1.bf16.msra.mxu1 %v856_v41  ;;  %773 = vmatpush3.bf16.msra.mxu0 %v878_v59  ;;  %v747_v41 = vld [vmem:[%s1150_s6] ss:$0 sm:$0xff] }
  0x7d   :  { %476 = vmatprep.subr.bf16.mxu1 %v857_v42  ;;  %774 = vmatprep.subr.bf16.mxu0 %v879_v60 }
  0x80   :  { %477 = vmatpush1.bf16.msra.mxu1 %v859_v43  ;;  %775 = vmatpush3.bf16.msra.mxu0 %v880_v18 }
  0x81   :  { %478 = vmatprep.subr.bf16.mxu1 %v860_v44  ;;  %776 = vmatprep.subr.bf16.mxu0 %v881_v19 }
  0x84   :  { %479 = vmatpush1.bf16.msra.mxu1 %v862_v45  ;;  %777 = vmatpush3.bf16.msra.mxu0 %v882_v20 }
  0x85   :  { %480 = vmatprep.subr.bf16.mxu1 %v863_v46  ;;  %778 = vmatprep.subr.bf16.mxu0 %v883_v21 }
  0x88   :  { %481 = vmatpush1.bf16.msra.mxu1 %v865_v47  ;;  %779 = vmatpush3.bf16.msra.mxu0 %v884_v22 }
  0x89   :  { %482 = vmatprep.subr.bf16.mxu1 %v866_v48 }
  0x8c   :  { %483 = vmatpush1.bf16.msra.mxu1 %v868_v49 }
 0x13e   :  { %v233_v4 = vpop.f32.mrb[0].mxu0 }
 0x13f   :  { %v234_v5 = vadd.f32 %v233_v4, %v106_v2  ;;  %v235_v6 = vpop.f32.mrb[1].mxu0 }
 0x140   :  { %v236_v7 = vadd.f32 %v235_v6, %v110_v3  ;;  %v237_v8 = vpop.f32.mrb[2].mxu0 }
 0x141   :  { %v238_v9 = vadd.f32 %v237_v8, %v106_v2  ;;  %v239_v10 = vpop.f32.mrb[3].mxu0  ;;  %v242_v12 = vmax.f32 %v234_v5, 0.0 }
 0x142   :  { %v240_v11 = vadd.f32 %v239_v10, %v110_v3  ;;  %v243_v14 = vmax.f32 %v236_v7, 0.0 }
 0x143   :  { %v244_v13 = vmax.f32 %v238_v9, 0.0 }
 0x144   :  { %v245_v15 = vmax.f32 %v240_v11, 0.0 }
 0x145   :  { %v246_v16 = vpack.c.bf16 %v244_v13, %v242_v12 }
 0x146   :  { %v247_v17 = vpack.c.bf16 %v245_v15, %v243_v14 }
 0x148   :  { %484 = vmatprep.mubr.bf16.mxu1 %v247_v17 }
 0x149   :  { %485 = vmatmul.mubr.bf16.vlgmr.msra.gmra.mrb[0].mxu1 %v246_v16 }
 0x21c   :  { %v486_v26 = vpop.f32.mrb[0].mxu1 }
 0x21d   :  { %v487_v27 = vadd.f32 %v486_v26, %v285_v24  ;;  %v488_v28 = vpop.f32.mrb[1].mxu1 }
 0x21e   :  { %v489_v29 = vadd.f32 %v488_v28, %v289_v25  ;;  %v490_v30 = vpop.f32.mrb[2].mxu1 }
 0x21f   :  { %v491_v31 = vadd.f32 %v490_v30, %v285_v24  ;;  %v492_v32 = vpop.f32.mrb[3].mxu1  ;;  %v495_v34 = vmax.f32 %v487_v27, 0.0 }
 0x220   :  { %v493_v33 = vadd.f32 %v492_v32, %v289_v25  ;;  %v496_v36 = vmax.f32 %v489_v29, 0.0 }
 0x221   :  { %v497_v35 = vmax.f32 %v491_v31, 0.0 }
 0x222   :  { %v498_v37 = vmax.f32 %v493_v33, 0.0 }
 0x223   :  { %v499_v38 = vpack.c.bf16 %v497_v35, %v495_v34 }
 0x224   :  { %v500_v39 = vpack.c.bf16 %v498_v37, %v496_v36 }
 0x226   :  { %668 = vmatprep.mubr.bf16.mxu0 %v500_v39 }
 0x227   :  { %669 = vmatmul.mubr.bf16.vlgmr.msra.gmra.mrb[4].mxu0 %v499_v38 }
 0x2fa   :  { %v780_v40 = vpop.f32.mrb[4].mxu0 }
 0x2fb   :  { %v781_v42 = vpop.f32.mrb[5].mxu0 }
 0x2fc   :  { %v782_v43 = vadd.f32 %v781_v42, %v780_v40  ;;  %v783_v44 = vpop.f32.mrb[6].mxu0 }
 0x2fd   :  { %v784_v45 = vpop.f32.mrb[7].mxu0 }
 0x2fe   :  { %v671_v46 = vadd.f32 %v782_v43, %v747_v41  ;;  %v785_v47 = vadd.f32 %v784_v45, %v783_v44 }
 0x300   :  { %677 = vst [vmem:[#allocation10] sm:$0xff] %v671_v46  ;;  %v674_v48 = vadd.f32 %v785_v47, %v747_v41 }
 0x302   :  { %678 = vst [vmem:[#allocation10 + $0x8] sm:$0xff] %v674_v48 }
 0x303   :  { %984 = shalt.err (!%p981_p8)
}
 0x304   :  { %s985_s14 = scalar_lea.hbm %s1151_s7, 256 }
 0x305   :  { %p986_p9 = scmp.ne.s32.totalorder %s1151_s7, %s985_s14  ;;  %p989_p10 = scmp.lt.u32.totalorder %s985_s14, %s1151_s7 }
 0x307   :  { %p991_p11 = pnand %p989_p10, %p986_p9 }
 0x309   :  { %994 = shalt.err (!%p991_p11)
}
 0x30a   :  { %690 = dma.vmem_to_hbm [thread:$0]  %s685_s9, 256, %s1151_s7, [#allocation4], %s1004_s11, %s1004_s11, %s1005_s12  }
 0x30b   :  { %1001 = dma.done.wait [#allocation4], 256  }
 0x30c   :  { %1002 = vsyncadd [#allocation4], 4294967040 }
 0x30d   :  { %694 = vsyncpa [#allocation3], 1 }
 0x30e   :  { %695 = vsyncpa [#allocation6], 1 }
 0x30f   :  { %696 = vsyncpa [#allocation9], 1 }
 0x310   :  { %697 = vsyncpa [#allocation4], 1 }

// kernel: tpu_custom_call.1
= control target key start
LH: loop header
LB: loop body
LE: loop exit
PB: predicated region body
PF: predicated region fallthrough
CT: control target
= control target key end

     0   :  { %12 = vsyncpa [#allocation3], 0  ;;  %s1144_s0 = inlined_call_operand.hbm [shape: bf16[16,128], index: 0, kind: input, shape index: {}]   ;;  %s1145_s1 = inlined_call_operand.hbm [shape: bf16[128,256], index: 1, kind: input, shape index: {}]   ;;  %s1146_s2 = inlined_call_operand.vmem [shape: f32[1,256], index: 2, kind: input, shape index: {}]   ;;  %s1147_s3 = inlined_call_operand.hbm [shape: bf16[256,256], index: 3, kind: input, shape index: {}]   ;;  %s1148_s4 = inlined_call_operand.vmem [shape: f32[1,256], index: 4, kind: input, shape index: {}]   ;;  %s1149_s5 = inlined_call_operand.hbm [shape: bf16[256,128], index: 5, kind: input, shape index: {}]   ;;  %s1150_s6 = inlined_call_operand.vmem [shape: f32[1,128], index: 6, kind: input, shape index: {}]   ;;  %s1151_s7 = inlined_call_operand.hbm [shape: f32[16,128], index: 7, kind: output, shape index: {}]  }
   0x1   :  { %13 = vsyncpa [#allocation6], 0 }
   0x2   :  { %14 = vsyncpa [#allocation9], 0 }
   0x3   :  { %15 = vsyncpa [#allocation4], 0  ;;  %s1003_s24 = smov [#allocation5]   ;;  %s885_s28 = scalar_lea.hbm %s1145_s1, 2048 }
   0x4   :  { %s33_s25 = sshll.u32 %s1003_s24, 4  ;;  %p886_p0 = scmp.ne.s32.totalorder %s1145_s1, %s885_s28  ;;  %s34_s25 = int_to_ptr.vmem [resolvable:$true] %s33_s25 }
   0x5   :  { %p889_p1 = scmp.lt.u32.totalorder %s885_s28, %s1145_s1 }
   0x7   :  { %p891_p2 = pnand %p889_p1, %p886_p0 }
   0x9   :  { %894 = shalt.err (!%p891_p2)
}
   0xa   :  { %s895_s10 = scalar_lea.vmem %s34_s25, 2048  ;;  %p900_p4 = scmp.lt.s32.totalorder %s34_s25, %s34_s25 }
   0xb   :  { %p896_p3 = scmp.ne.s32.totalorder %s34_s25, %s895_s10  ;;  %p901_p5 = scmp.lt.s32.totalorder %s895_s10, %s895_s10 }
   0xd   :  { %p902_p6 = por %p901_p5, %p900_p4 }
   0xf   :  { %p903_p7 = pnand %p902_p6, %p896_p3 }
  0x11   :  { %906 = shalt.err (!%p903_p7)
}
  0x12   :  { %s1004_s11 = smov 128   ;;  %s1005_s12 = smov 8  }
  0x13   :  { %39 = dma.hbm_to_vmem [thread:$0]  %s1145_s1, 2048, %s34_s25, [#allocation6], %s1004_s11, %s1004_s11, %s1005_s12  }
  0x14   :  { %s1006_s15 = smov [#allocation2]   ;;  %s907_s19 = scalar_lea.hbm %s1144_s0, 128 }
  0x15   :  { %s21_s16 = sshll.u32 %s1006_s15, 4  ;;  %p908_p8 = scmp.ne.s32.totalorder %s1144_s0, %s907_s19  ;;  %s22_s16 = int_to_ptr.vmem [resolvable:$true] %s21_s16 }
  0x16   :  { %p911_p9 = scmp.lt.u32.totalorder %s907_s19, %s1144_s0 }
  0x18   :  { %p913_p10 = pnand %p911_p9, %p908_p8 }
  0x1a   :  { %916 = shalt.err (!%p913_p10)
}
  0x1b   :  { %s917_s24 = scalar_lea.vmem %s22_s16, 128  ;;  %p922_p12 = scmp.lt.s32.totalorder %s22_s16, %s22_s16 }
  0x1c   :  { %p918_p11 = scmp.ne.s32.totalorder %s22_s16, %s917_s24  ;;  %p923_p13 = scmp.lt.s32.totalorder %s917_s24, %s917_s24 }
  0x1e   :  { %p924_p0 = por %p923_p13, %p922_p12 }
  0x20   :  { %p925_p1 = pnand %p924_p0, %p918_p11 }
  0x22   :  { %928 = shalt.err (!%p925_p1)
}
  0x23   :  { %s1007_s1 = smov 64   ;;  %s1008_s25 = smov 4  }
  0x24   :  { %27 = dma.hbm_to_vmem [thread:$0]  %s1144_s0, 128, %s22_s16, [#allocation3], %s1007_s1, %s1007_s1, %s1008_s25  }
  0x25   :  { %s1009_s28 = smov [#allocation7]   ;;  %s1010_s30 = smov [#allocation8]  }
  0x26   :  { %s47_s29 = sshll.u32 %s1009_s28, 4  ;;  %s61_s8 = sshll.u32 %s1010_s30, 4  ;;  %s48_s29 = int_to_ptr.vmem [resolvable:$true] %s47_s29  ;;  %s1083_s8 = int_to_ptr.vmem [resolvable:$true] %s61_s8 }
  0x27   :  { %s929_s13 = scalar_lea.hbm %s1147_s3, 4096 }
  0x28   :  { %p930_p2 = scmp.ne.s32.totalorder %s1147_s3, %s929_s13  ;;  %p933_p3 = scmp.lt.u32.totalorder %s929_s13, %s1147_s3 }
  0x2a   :  { %p935_p4 = pnand %p933_p3, %p930_p2 }
  0x2c   :  { %938 = shalt.err (!%p935_p4)
}
  0x2d   :  { %s939_s0 = scalar_lea.vmem %s48_s29, 4096  ;;  %p944_p6 = scmp.lt.s32.totalorder %s48_s29, %s48_s29 }
  0x2e   :  { %p940_p5 = scmp.ne.s32.totalorder %s48_s29, %s939_s0  ;;  %p945_p7 = scmp.lt.s32.totalorder %s939_s0, %s939_s0 }
  0x30   :  { %p946_p8 = por %p945_p7, %p944_p6 }
  0x32   :  { %p947_p9 = pnand %p946_p8, %p940_p5 }
  0x34   :  { %950 = shalt.err (!%p947_p9)
}
  0x35   :  { %53 = dma.hbm_to_vmem [thread:$0]  %s1147_s3, 4096, %s48_s29, [#allocation6], %s1004_s11, %s1004_s11, %s1005_s12  }
  0x36   :  { %s951_s22 = scalar_lea.hbm %s1149_s5, 2048 }
  0x37   :  { %p952_p10 = scmp.ne.s32.totalorder %s1149_s5, %s951_s22  ;;  %p955_p11 = scmp.lt.u32.totalorder %s951_s22, %s1149_s5 }
  0x39   :  { %p957_p12 = pnand %p955_p11, %p952_p10 }
  0x3b   :  { %960 = shalt.err (!%p957_p12)
}
  0x3c   :  { %s961_s28 = scalar_lea.vmem %s1083_s8, 2048  ;;  %p966_p0 = scmp.lt.s32.totalorder %s1083_s8, %s1083_s8 }
  0x3d   :  { %p962_p13 = scmp.ne.s32.totalorder %s1083_s8, %s961_s28  ;;  %p967_p1 = scmp.lt.s32.totalorder %s961_s28, %s961_s28 }
  0x3f   :  { %p968_p2 = por %p967_p1, %p966_p0 }
  0x41   :  { %p969_p3 = pnand %p968_p2, %p962_p13 }
  0x43   :  { %972 = shalt.err (!%p969_p3)
}
  0x44   :  { %67 = dma.hbm_to_vmem [thread:$0]  %s1149_s5, 2048, %s1083_s8, [#allocation9], %s1007_s1, %s1007_s1, %s1008_s25  }
  0x45   :  { %995 = dma.done.wait [#allocation3], 128  }
  0x46   :  { %996 = vsyncadd [#allocation3], 4294967168 }
  0x47   :  { %997 = dma.done.wait [#allocation6], 6144  }
  0x48   :  { %998 = vsyncadd [#allocation6], 4294961152 }
  0x49   :  { %999 = dma.done.wait [#allocation9], 2048  }
  0x4a   :  { %1000 = vsyncadd [#allocation9], 4294965248  ;;  %v1011_v0 = vmov 0   ;;  %v796_v1 = vld [vmem:[#allocation5 + $0x4] ss:$8 sps:$4 sm:$0xff]   ;;  %v820_v27 = vld [vmem:[#allocation2] sm:$0xff]   ;;  %v103_v61 = vlaneseq }
  0x4b   :  { %231 = vmatprep.mubr.bf16.mxu0 %v1011_v0  ;;  %v798_v2 = vld [vmem:[#allocation5] ss:$8 sps:$4 sm:$0xff]   ;;  %199 = vmatprep.subr.bf16.mxu0 %v796_v1  ;;  %v799_v3 = vld [vmem:[#allocation5 + $0x14] ss:$8 sps:$4 sm:$0xff]   ;;  %v801_v4 = vld [vmem:[#allocation5 + $0x10] ss:$8 sps:$4 sm:$0xff]  }
  0x4c   :  { %200 = vmatpush1.bf16.msra.mxu0 %v798_v2  ;;  %v802_v5 = vld [vmem:[#allocation5 + $0x24] ss:$8 sps:$4 sm:$0xff]   ;;  %v804_v6 = vld [vmem:[#allocation5 + $0x20] ss:$8 sps:$4 sm:$0xff]   ;;  %v805_v7 = vld [vmem:[#allocation5 + $0x34] ss:$8 sps:$4 sm:$0xff]  }
  0x4d   :  { %201 = vmatprep.subr.bf16.mxu0 %v799_v3  ;;  %v807_v8 = vld [vmem:[#allocation5 + $0x30] ss:$8 sps:$4 sm:$0xff]   ;;  %v808_v9 = vld [vmem:[#allocation5 + $0x44] ss:$8 sps:$4 sm:$0xff]   ;;  %v823_v11 = vld [vmem:[#allocation7] ss:$8 sps:$4 sm:$0xff]  }
  0x4e   :  { %v821_v10 = vld [vmem:[#allocation7 + $0x4] ss:$8 sps:$4 sm:$0xff]   ;;  %v824_v12 = vld [vmem:[#allocation7 + $0x14] ss:$8 sps:$4 sm:$0xff]   ;;  %v810_v13 = vld [vmem:[#allocation5 + $0x40] ss:$8 sps:$4 sm:$0xff]  }
  0x4f   :  { %452 = vmatprep.subr.bf16.mxu1 %v821_v10  ;;  %v826_v14 = vld [vmem:[#allocation7 + $0x10] ss:$8 sps:$4 sm:$0xff]   ;;  %v811_v15 = vld [vmem:[#allocation5 + $0x54] ss:$8 sps:$4 sm:$0xff]   ;;  %v827_v16 = vld [vmem:[#allocation7 + $0x24] ss:$8 sps:$4 sm:$0xff]  }
  0x50   :  { %202 = vmatpush1.bf16.msra.mxu0 %v801_v4  ;;  %453 = vmatpush1.bf16.msra.mxu1 %v823_v11  ;;  %v813_v17 = vld [vmem:[#allocation5 + $0x50] ss:$8 sps:$4 sm:$0xff]   ;;  %v829_v18 = vld [vmem:[#allocation7 + $0x20] ss:$8 sps:$4 sm:$0xff]   ;;  %v814_v19 = vld [vmem:[#allocation5 + $0x64] ss:$8 sps:$4 sm:$0xff]  }
  0x51   :  { %203 = vmatprep.subr.bf16.mxu0 %v802_v5  ;;  %454 = vmatprep.subr.bf16.mxu1 %v824_v12  ;;  %v830_v20 = vld [vmem:[#allocation7 + $0x34] ss:$8 sps:$4 sm:$0xff]   ;;  %v816_v21 = vld [vmem:[#allocation5 + $0x60] ss:$8 sps:$4 sm:$0xff]   ;;  %v832_v22 = vld [vmem:[#allocation7 + $0x30] ss:$8 sps:$4 sm:$0xff]  }
  0x52   :  { %v817_v23 = vld [vmem:[#allocation5 + $0x74] ss:$8 sps:$4 sm:$0xff]   ;;  %v833_v24 = vld [vmem:[#allocation7 + $0x44] ss:$8 sps:$4 sm:$0xff]   ;;  %v819_v25 = vld [vmem:[#allocation5 + $0x70] ss:$8 sps:$4 sm:$0xff]  }
  0x53   :  { %v835_v26 = vld [vmem:[#allocation7 + $0x40] ss:$8 sps:$4 sm:$0xff]   ;;  %v836_v28 = vld [vmem:[#allocation7 + $0x54] ss:$8 sps:$4 sm:$0xff]   ;;  %v838_v29 = vld [vmem:[#allocation7 + $0x50] ss:$8 sps:$4 sm:$0xff]  }
  0x54   :  { %204 = vmatpush1.bf16.msra.mxu0 %v804_v6  ;;  %455 = vmatpush1.bf16.msra.mxu1 %v826_v14  ;;  %v839_v30 = vld [vmem:[#allocation7 + $0x64] ss:$8 sps:$4 sm:$0xff]   ;;  %v841_v31 = vld [vmem:[#allocation7 + $0x60] ss:$8 sps:$4 sm:$0xff]   ;;  %v842_v32 = vld [vmem:[#allocation7 + $0x74] ss:$8 sps:$4 sm:$0xff]  }
  0x55   :  { %205 = vmatprep.subr.bf16.mxu0 %v805_v7  ;;  %456 = vmatprep.subr.bf16.mxu1 %v827_v16  ;;  %v844_v33 = vld [vmem:[#allocation7 + $0x70] ss:$8 sps:$4 sm:$0xff]   ;;  %v845_v34 = vld [vmem:[#allocation7 + $0x84] ss:$8 sps:$4 sm:$0xff]   ;;  %v847_v35 = vld [vmem:[#allocation7 + $0x80] ss:$8 sps:$4 sm:$0xff]  }
  0x56   :  { %v848_v36 = vld [vmem:[#allocation7 + $0x94] ss:$8 sps:$4 sm:$0xff]   ;;  %v850_v37 = vld [vmem:[#allocation7 + $0x90] ss:$8 sps:$4 sm:$0xff]   ;;  %v851_v38 = vld [vmem:[#allocation7 + $0xa4] ss:$8 sps:$4 sm:$0xff]  }
  0x57   :  { %v853_v39 = vld [vmem:[#allocation7 + $0xa0] ss:$8 sps:$4 sm:$0xff]   ;;  %v854_v40 = vld [vmem:[#allocation7 + $0xb4] ss:$8 sps:$4 sm:$0xff]   ;;  %v856_v41 = vld [vmem:[#allocation7 + $0xb0] ss:$8 sps:$4 sm:$0xff]  }
  0x58   :  { %206 = vmatpush1.bf16.msra.mxu0 %v807_v8  ;;  %457 = vmatpush1.bf16.msra.mxu1 %v829_v18  ;;  %v857_v42 = vld [vmem:[#allocation7 + $0xc4] ss:$8 sps:$4 sm:$0xff]   ;;  %v859_v43 = vld [vmem:[#allocation7 + $0xc0] ss:$8 sps:$4 sm:$0xff]   ;;  %v860_v44 = vld [vmem:[#allocation7 + $0xd4] ss:$8 sps:$4 sm:$0xff]  }
  0x59   :  { %207 = vmatprep.subr.bf16.mxu0 %v808_v9  ;;  %458 = vmatprep.subr.bf16.mxu1 %v830_v20  ;;  %v862_v45 = vld [vmem:[#allocation7 + $0xd0] ss:$8 sps:$4 sm:$0xff]   ;;  %v863_v46 = vld [vmem:[#allocation7 + $0xe4] ss:$8 sps:$4 sm:$0xff]   ;;  %v865_v47 = vld [vmem:[#allocation7 + $0xe0] ss:$8 sps:$4 sm:$0xff]  }
  0x5a   :  { %v866_v48 = vld [vmem:[#allocation7 + $0xf4] ss:$8 sps:$4 sm:$0xff]   ;;  %v868_v49 = vld [vmem:[#allocation7 + $0xf0] ss:$8 sps:$4 sm:$0xff]   ;;  %v869_v50 = vld [vmem:[#allocation8 + $0x40] sm:$0xff]   ;;  %v104_v62 = vshrl.u32 %v103_v61, 7 }
  0x5b   :  { %v870_v51 = vld [vmem:[#allocation8] sm:$0xff]   ;;  %v871_v52 = vld [vmem:[#allocation8 + $0x48] sm:$0xff]   ;;  %v873_v54 = vld [vmem:[#allocation8 + $0x50] sm:$0xff]   ;;  %s1012_s8 = smov [#allocation10]  }
  0x5c   :  { %208 = vmatpush1.bf16.msra.mxu0 %v810_v13  ;;  %459 = vmatpush1.bf16.msra.mxu1 %v832_v22  ;;  %v872_v53 = vld [vmem:[#allocation8 + $0x8] sm:$0xff]   ;;  %v874_v55 = vld [vmem:[#allocation8 + $0x10] sm:$0xff]   ;;  %v875_v56 = vld [vmem:[#allocation8 + $0x58] sm:$0xff]   ;;  %v105_v63 = vsub.s32 0, %v104_v62  ;;  %v109_v1 = vsub.s32 1, %v104_v62  ;;  %s684_s9 = sshll.u32 %s1012_s8, 4  ;;  %s685_s9 = int_to_ptr.vmem [resolvable:$true] %s684_s9 }
  0x5d   :  { %209 = vmatprep.subr.bf16.mxu0 %v811_v15  ;;  %460 = vmatprep.subr.bf16.mxu1 %v833_v24  ;;  %v876_v57 = vld [vmem:[#allocation8 + $0x18] sm:$0xff]   ;;  %v877_v58 = vld [vmem:[#allocation8 + $0x60] sm:$0xff]   ;;  %v879_v60 = vld [vmem:[#allocation8 + $0x68] sm:$0xff]   ;;  %s973_s10 = scalar_lea.vmem %s685_s9, 256  ;;  %p978_p5 = scmp.lt.s32.totalorder %s685_s9, %s685_s9 }
  0x5e   :  { %v878_v59 = vld [vmem:[#allocation8 + $0x20] sm:$0xff]   ;;  %v101_v0 = vld [vmem:[%s1146_s2] sm:$0x3]  ;;  %v880_v18 = vld [vmem:[#allocation8 + $0x28] sm:$0xff]   ;;  %p974_p4 = scmp.ne.s32.totalorder %s685_s9, %s973_s10  ;;  %p979_p6 = scmp.lt.s32.totalorder %s973_s10, %s973_s10 }
  0x5f   :  { %v106_v2 = vrot.slane %v101_v0, %v105_v63  ;;  %v110_v3 = vrot.slane %v101_v0, %v109_v1  ;;  %v882_v20 = vld [vmem:[#allocation8 + $0x30] sm:$0xff]   ;;  %v884_v22 = vld [vmem:[#allocation8 + $0x38] sm:$0xff]  }
  0x60   :  { %210 = vmatpush1.bf16.msra.mxu0 %v813_v17  ;;  %461 = vmatpush1.bf16.msra.mxu1 %v835_v26  ;;  %p980_p7 = por %p979_p6, %p978_p5 }
  0x61   :  { %211 = vmatprep.subr.bf16.mxu0 %v814_v19  ;;  %462 = vmatprep.subr.bf16.mxu1 %v836_v28  ;;  %v881_v19 = vld [vmem:[#allocation8 + $0x70] sm:$0xff]  }
  0x62   :  { %p981_p8 = pnand %p980_p7, %p974_p4 }
  0x64   :  { %212 = vmatpush1.bf16.msra.mxu0 %v816_v21  ;;  %463 = vmatpush1.bf16.msra.mxu1 %v838_v29  ;;  %v883_v21 = vld [vmem:[#allocation8 + $0x78] sm:$0xff]  }
  0x65   :  { %213 = vmatprep.subr.bf16.mxu0 %v817_v23  ;;  %464 = vmatprep.subr.bf16.mxu1 %v839_v30  ;;  %v280_v23 = vld [vmem:[%s1148_s4] sm:$0x3] }
  0x66   :  { %v285_v24 = vrot.slane %v280_v23, %v105_v63 }
  0x68   :  { %214 = vmatpush1.bf16.msra.mxu0 %v819_v25  ;;  %465 = vmatpush1.bf16.msra.mxu1 %v841_v31  ;;  %v289_v25 = vrot.slane %v280_v23, %v109_v1 }
  0x69   :  { %466 = vmatprep.subr.bf16.mxu1 %v842_v32  ;;  %764 = vmatprep.subr.bf16.mxu0 %v869_v50 }
  0x6b   :  { %232 = vmatmul.mubr.bf16.vlgmr.msra.gmra.mrb[0].mxu0 %v820_v27 }
  0x6c   :  { %467 = vmatpush1.bf16.msra.mxu1 %v844_v33  ;;  %765 = vmatpush3.bf16.msra.mxu0 %v870_v51 }
  0x6d   :  { %468 = vmatprep.subr.bf16.mxu1 %v845_v34  ;;  %766 = vmatprep.subr.bf16.mxu0 %v871_v52 }
  0x70   :  { %469 = vmatpush1.bf16.msra.mxu1 %v847_v35  ;;  %767 = vmatpush3.bf16.msra.mxu0 %v872_v53 }
  0x71   :  { %470 = vmatprep.subr.bf16.mxu1 %v848_v36  ;;  %768 = vmatprep.subr.bf16.mxu0 %v873_v54 }
  0x74   :  { %471 = vmatpush1.bf16.msra.mxu1 %v850_v37  ;;  %769 = vmatpush3.bf16.msra.mxu0 %v874_v55 }
  0x75   :  { %472 = vmatprep.subr.bf16.mxu1 %v851_v38  ;;  %770 = vmatprep.subr.bf16.mxu0 %v875_v56 }
  0x78   :  { %473 = vmatpush1.bf16.msra.mxu1 %v853_v39  ;;  %771 = vmatpush3.bf16.msra.mxu0 %v876_v57 }
  0x79   :  { %474 = vmatprep.subr.bf16.mxu1 %v854_v40  ;;  %772 = vmatprep.subr.bf16.mxu0 %v877_v58 }
  0x7c   :  { %475 = vmatpush1.bf16.msra.mxu1 %v856_v41  ;;  %773 = vmatpush3.bf16.msra.mxu0 %v878_v59  ;;  %v747_v41 = vld [vmem:[%s1150_s6] ss:$0 sm:$0xff] }
  0x7d   :  { %476 = vmatprep.subr.bf16.mxu1 %v857_v42  ;;  %774 = vmatprep.subr.bf16.mxu0 %v879_v60 }
  0x80   :  { %477 = vmatpush1.bf16.msra.mxu1 %v859_v43  ;;  %775 = vmatpush3.bf16.msra.mxu0 %v880_v18 }
  0x81   :  { %478 = vmatprep.subr.bf16.mxu1 %v860_v44  ;;  %776 = vmatprep.subr.bf16.mxu0 %v881_v19 }
  0x84   :  { %479 = vmatpush1.bf16.msra.mxu1 %v862_v45  ;;  %777 = vmatpush3.bf16.msra.mxu0 %v882_v20 }
  0x85   :  { %480 = vmatprep.subr.bf16.mxu1 %v863_v46  ;;  %778 = vmatprep.subr.bf16.mxu0 %v883_v21 }
  0x88   :  { %481 = vmatpush1.bf16.msra.mxu1 %v865_v47  ;;  %779 = vmatpush3.bf16.msra.mxu0 %v884_v22 }
  0x89   :  { %482 = vmatprep.subr.bf16.mxu1 %v866_v48 }
  0x8c   :  { %483 = vmatpush1.bf16.msra.mxu1 %v868_v49 }
 0x13e   :  { %v233_v4 = vpop.f32.mrb[0].mxu0 }
 0x13f   :  { %v234_v5 = vadd.f32 %v233_v4, %v106_v2  ;;  %v235_v6 = vpop.f32.mrb[1].mxu0 }
 0x140   :  { %v236_v7 = vadd.f32 %v235_v6, %v110_v3  ;;  %v237_v8 = vpop.f32.mrb[2].mxu0 }
 0x141   :  { %v238_v9 = vadd.f32 %v237_v8, %v106_v2  ;;  %v239_v10 = vpop.f32.mrb[3].mxu0  ;;  %v242_v12 = vmax.f32 %v234_v5, 0.0 }
 0x142   :  { %v240_v11 = vadd.f32 %v239_v10, %v110_v3  ;;  %v243_v14 = vmax.f32 %v236_v7, 0.0 }
 0x143   :  { %v244_v13 = vmax.f32 %v238_v9, 0.0 }
 0x144   :  { %v245_v15 = vmax.f32 %v240_v11, 0.0 }
 0x145   :  { %v246_v16 = vpack.c.bf16 %v244_v13, %v242_v12 }
 0x146   :  { %v247_v17 = vpack.c.bf16 %v245_v15, %v243_v14 }
 0x148   :  { %484 = vmatprep.mubr.bf16.mxu1 %v247_v17 }
 0x149   :  { %485 = vmatmul.mubr.bf16.vlgmr.msra.gmra.mrb[0].mxu1 %v246_v16 }
 0x21c   :  { %v486_v26 = vpop.f32.mrb[0].mxu1 }
 0x21d   :  { %v487_v27 = vadd.f32 %v486_v26, %v285_v24  ;;  %v488_v28 = vpop.f32.mrb[1].mxu1 }
 0x21e   :  { %v489_v29 = vadd.f32 %v488_v28, %v289_v25  ;;  %v490_v30 = vpop.f32.mrb[2].mxu1 }
 0x21f   :  { %v491_v31 = vadd.f32 %v490_v30, %v285_v24  ;;  %v492_v32 = vpop.f32.mrb[3].mxu1  ;;  %v495_v34 = vmax.f32 %v487_v27, 0.0 }
 0x220   :  { %v493_v33 = vadd.f32 %v492_v32, %v289_v25  ;;  %v496_v36 = vmax.f32 %v489_v29, 0.0 }
 0x221   :  { %v497_v35 = vmax.f32 %v491_v31, 0.0 }
 0x222   :  { %v498_v37 = vmax.f32 %v493_v33, 0.0 }
 0x223   :  { %v499_v38 = vpack.c.bf16 %v497_v35, %v495_v34 }
 0x224   :  { %v500_v39 = vpack.c.bf16 %v498_v37, %v496_v36 }
 0x226   :  { %668 = vmatprep.mubr.bf16.mxu0 %v500_v39 }
 0x227   :  { %669 = vmatmul.mubr.bf16.vlgmr.msra.gmra.mrb[4].mxu0 %v499_v38 }
 0x2fa   :  { %v780_v40 = vpop.f32.mrb[4].mxu0 }
 0x2fb   :  { %v781_v42 = vpop.f32.mrb[5].mxu0 }
 0x2fc   :  { %v782_v43 = vadd.f32 %v781_v42, %v780_v40  ;;  %v783_v44 = vpop.f32.mrb[6].mxu0 }
 0x2fd   :  { %v784_v45 = vpop.f32.mrb[7].mxu0 }
 0x2fe   :  { %v671_v46 = vadd.f32 %v782_v43, %v747_v41  ;;  %v785_v47 = vadd.f32 %v784_v45, %v783_v44 }
 0x300   :  { %677 = vst [vmem:[#allocation10] sm:$0xff] %v671_v46  ;;  %v674_v48 = vadd.f32 %v785_v47, %v747_v41 }
 0x302   :  { %678 = vst [vmem:[#allocation10 + $0x8] sm:$0xff] %v674_v48 }
 0x303   :  { %984 = shalt.err (!%p981_p8)
}
 0x304   :  { %s985_s14 = scalar_lea.hbm %s1151_s7, 256 }
 0x305   :  { %p986_p9 = scmp.ne.s32.totalorder %s1151_s7, %s985_s14  ;;  %p989_p10 = scmp.lt.u32.totalorder %s985_s14, %s1151_s7 }
 0x307   :  { %p991_p11 = pnand %p989_p10, %p986_p9 }
 0x309   :  { %994 = shalt.err (!%p991_p11)
}
 0x30a   :  { %690 = dma.vmem_to_hbm [thread:$0]  %s685_s9, 256, %s1151_s7, [#allocation4], %s1004_s11, %s1004_s11, %s1005_s12  }
 0x30b   :  { %1001 = dma.done.wait [#allocation4], 256  }
 0x30c   :  { %1002 = vsyncadd [#allocation4], 4294967040 }
 0x30d   :  { %694 = vsyncpa [#allocation3], 1 }
 0x30e   :  { %695 = vsyncpa [#allocation6], 1 }
 0x30f   :  { %696 = vsyncpa [#allocation9], 1 }
 0x310   :  { %697 = vsyncpa [#allocation4], 1 }

</bundles_post_ra>
